<compile_context>
chip_gen: v5e
topology: v5e:2x2
jax: 0.10.0
libtpu: 0.0.40
codegen_flags: <defaults>
</compile_context>

<pallas_src>
import functools

import numpy as np
import jax
import jax.numpy as jnp
from jax.experimental import pallas as pl
from jax.experimental.pallas import tpu as pltpu


def _round_up(x, m):
    return ((x + m - 1) // m) * m


def _refine_kernel(x_ref, w_ref, b_ref, o_ref, acc_ref, *, nosoft):
    """One (row-tile, k-tile) grid step: acc += x @ w; finalize at last k."""
    k = pl.program_id(1)

    @pl.when(k == 0)
    def _():
        acc_ref[...] = jnp.zeros_like(acc_ref)

    # bf16 x bf16 -> f32 accumulate on the MXU; weight already (K, dim_out).
    acc_ref[...] += jnp.dot(x_ref[...], w_ref[...],
                            preferred_element_type=jnp.float32)

    @pl.when(k == pl.num_programs(1) - 1)
    def _():
        logits = acc_ref[...] + b_ref[...]
        if nosoft:
            o_ref[...] = logits.astype(o_ref.dtype)
        else:
            # Exact softmax: max-shift, exp, sum, exact divide (NOT the approx
            # EUP reciprocal — rows must sum to 1 within f32 tolerance).
            m = jnp.max(logits, axis=1, keepdims=True)
            e = jnp.exp(logits - m)
            denom = jnp.sum(e, axis=1, keepdims=True)
            o_ref[...] = (e / denom).astype(o_ref.dtype)
        # NOTE: tail row-tiles (n % tm != 0) compute on out-of-bounds rows; the
        # exp there may produce inf/nan but those rows are never stored back.


# Tunables -------------------------------------------------------------------
_VMEM_BUDGET = 48 * 1024 * 1024    # conservative: v7x has 64 MiB physical VMEM
_MAX_ROWS = 1024                   # amortizes the ~0.35us/step pipeline cost
_K_SPLIT_BYTES = 8 * 1024 * 1024   # split dim_in when one weight slab > this


def refine_ind_outputs(x, weight, bias, nosoft=True,
                       compute_dtype=jnp.bfloat16):
    """JAX/Pallas equivalent of refine_IND_outputs.forward.

    Args:
      x: (N, dim_in) or (N, dim_in, 1, 1) activations.
      weight: (dim_out, dim_in) — PyTorch nn.Linear layout (NOT transposed).
      bias: (dim_out,).
      nosoft: if True return raw scores, else softmax over dim 1.
      compute_dtype: matmul operand dtype (bf16 feeds the MXU natively;
        accumulation is always f32).
    """
    if x.ndim == 4:
        x = x[:, :, 0, 0]                      # squeeze(3).squeeze(2)
    n, dim_in = x.shape
    dim_out = weight.shape[0]
    x_bytes = np.dtype(compute_dtype).itemsize
    lanes_out = _round_up(max(dim_out, 1), 128)   # VMEM lane padding of blocks

    # ---- K (dim_in) tiling ---------------------------------------------------
    if dim_in * lanes_out * x_bytes <= _K_SPLIT_BYTES:
        tk, dim_in_pad, k_tiles = dim_in, dim_in, 1
    else:
        tk = max(128,
                 ((_K_SPLIT_BYTES // 2) // (lanes_out * x_bytes)) // 128 * 128)
        dim_in_pad = _round_up(dim_in, tk)     # zero-padded: neutral in the dot
        k_tiles = dim_in_pad // tk

    # ---- M (batch) tiling, sized against an explicit VMEM budget -------------
    w_bufs = 1 if k_tiles == 1 else 2          # single-buffer invariant weight

    def _vmem_bytes(tm):
        tm8 = _round_up(max(tm, 1), 8)
        return (2 * tm8 * _round_up(tk, 128) * x_bytes        # x (double-buf)
                + w_bufs * _round_up(tk, 8) * lanes_out * x_bytes  # weight
                + 2 * tm8 * lanes_out * 4                     # out (double-buf)
                + tm8 * lanes_out * 4                         # f32 accumulator
                + 2 * lanes_out * 4)                          # bias

    tm = min(_MAX_ROWS, _round_up(n, 8))
    while tm > 8 and _vmem_bytes(tm) > _VMEM_BUDGET:
        tm = _round_up(tm // 2, 8)

    n_tiles = pl.cdiv(n, tm)
    if n_tiles == 1 and n >= 256:
        n_tiles = 2                            # let v7x's 2nd TensorCore work
    if n_tiles > 1:
        tm = _round_up(pl.cdiv(n, n_tiles), 8)  # balanced: no ~empty tail tile
    else:
        tm = n                                 # single tile: block == full dim

    # ---- Operand prep (one-time, wrapper side) --------------------------------
    x_c = x.astype(compute_dtype)
    w_t = weight.astype(compute_dtype).T       # (dim_in, dim_out), done once
    if dim_in_pad != dim_in:
        pad_k = dim_in_pad - dim_in
        x_c = jnp.pad(x_c, ((0, 0), (0, pad_k)))
        w_t = jnp.pad(w_t, ((0, pad_k), (0, 0)))
    b2d = bias.astype(jnp.float32).reshape(1, dim_out)

    # Grid-invariant operands don't need double buffering.
    bias_spec = pl.BlockSpec((1, dim_out), lambda i, k: (0, 0),
                             pipeline_mode=pl.Buffered(1))
    if k_tiles == 1:
        w_spec = pl.BlockSpec((tk, dim_out), lambda i, k: (k, 0),
                              pipeline_mode=pl.Buffered(1))
    else:
        w_spec = pl.BlockSpec((tk, dim_out), lambda i, k: (k, 0))

    flops = 2 * n * dim_in_pad * dim_out
    transcendentals = 0 if nosoft else n * dim_out
    bytes_accessed = (n * dim_in_pad * x_bytes
                      + dim_in_pad * dim_out * x_bytes
                      + dim_out * 4
                      + n * dim_out * 4)
    vmem_limit = int(min(64 * 1024 * 1024,
                         max(2 * _vmem_bytes(tm), 8 * 1024 * 1024)))

    out = pl.pallas_call(
        functools.partial(_refine_kernel, nosoft=nosoft),
        out_shape=jax.ShapeDtypeStruct((n, dim_out), jnp.float32),
        grid_spec=pltpu.PrefetchScalarGridSpec(
            num_scalar_prefetch=0,
            grid=(n_tiles, k_tiles),           # reduction (K) axis last
            in_specs=[
                pl.BlockSpec((tm, tk), lambda i, k: (i, k)),   # x row/K tiles
                w_spec,                                        # weight K tiles
                bias_spec,                                     # bias (resident)
            ],
            out_specs=pl.BlockSpec((tm, dim_out), lambda i, k: (i, 0)),
            scratch_shapes=[pltpu.VMEM((tm, dim_out), jnp.float32)],
        ),
        compiler_params=pltpu.CompilerParams(
            dimension_semantics=("parallel", "arbitrary"),
            vmem_limit_bytes=vmem_limit),
        cost_estimate=pl.CostEstimate(
            flops=flops,
            transcendentals=transcendentals,
            bytes_accessed=bytes_accessed),
    )(x_c, w_t, b2d)

    return out


if __name__ == "__main__":
    key = jax.random.PRNGKey(0)
    k_x, k_w = jax.random.split(key)

    N, DIM_IN, DIM_OUT = 8, 32, 16

    # Deterministic "init": weight ~ N(0, 0.01), bias = 0 (matches _init_weights).
    weight = 0.01 * jax.random.normal(k_w, (DIM_OUT, DIM_IN), dtype=jnp.float32)
    bias = jnp.zeros((DIM_OUT,), dtype=jnp.float32)

    # 4D input (N, C, 1, 1) to exercise the squeeze path, NCHW convention.
    x = jax.random.normal(k_x, (N, DIM_IN, 1, 1), dtype=jnp.float32)

    # nosoft=True path (module default behavior).
    out = jax.block_until_ready(refine_ind_outputs(x, weight, bias, nosoft=True))

    # Reference computed with the same bf16 operand quantization + f32 accumulate
    # that the kernel uses (the documented precision choice for the MXU path).
    x2d = x[:, :, 0, 0]
    xb = x2d.astype(jnp.bfloat16).astype(jnp.float32)
    wb = weight.astype(jnp.bfloat16).astype(jnp.float32)
    ref = xb @ wb.T + bias
    assert out.shape == (N, DIM_OUT)
    assert jnp.allclose(out, ref, atol=1e-4, rtol=1e-4)

    # Softmax (nosoft=False) path — exact softmax, so tight tolerance holds.
    out_sm = jax.block_until_ready(
        refine_ind_outputs(x, weight, bias, nosoft=False))
    ref_sm = jax.nn.softmax(ref, axis=1)
    assert out_sm.shape == (N, DIM_OUT)
    assert jnp.allclose(out_sm, ref_sm, atol=1e-4, rtol=1e-4)

    print("KERNEL_OK")
</pallas_src>

<mosaic_0001>
module attributes {stable_mosaic.version = 11 : i64} {
  func.func @_refine_kernel(%arg0: i32, %arg1: i32, %arg2: memref<8x32xbf16, #tpu.memory_space<vmem>>, %arg3: memref<32x16xbf16, #tpu.memory_space<vmem>>, %arg4: memref<1x16xf32, #tpu.memory_space<vmem>>, %arg5: memref<8x16xf32, #tpu.memory_space<vmem>>, %arg6: memref<8x16xf32, #tpu.memory_space<vmem>>) attributes {dimension_semantics = [#tpu.dimension_semantics<parallel>, #tpu.dimension_semantics<arbitrary>], iteration_bounds = array<i64: 1, 1>, scalar_prefetch = 0 : i64, scratch_operands = 1 : i64, tpu.core_type = #tpu.core_type<tc>, window_params = [{transform_indices = @transform_0, window_bounds = array<i64: 8, 32>}, {pipeline_mode = #tpu.pipeline_mode<synchronous>, transform_indices = @transform_1, window_bounds = array<i64: 32, 16>}, {pipeline_mode = #tpu.pipeline_mode<synchronous>, transform_indices = @transform_2, window_bounds = array<i64: 1, 16>}, {transform_indices = @transform_3, window_bounds = array<i64: 8, 16>}]} {
    %c0_i32 = arith.constant 0 : i32
    %0 = arith.cmpi eq, %arg1, %c0_i32 : i32
    %1 = arith.extui %0 : i1 to i32
    %c0_i32_0 = arith.constant 0 : i32
    %2 = arith.cmpi ne, %1, %c0_i32_0 : i32
    scf.if %2 {
      %cst_10 = arith.constant 0.000000e+00 : f32
      %12 = vector.broadcast %cst_10 : f32 to vector<8x16xf32>
      %c0_11 = arith.constant 0 : index
      %c0_12 = arith.constant 0 : index
      %13 = vector.load %arg6[%c0_11, %c0_12] : memref<8x16xf32, #tpu.memory_space<vmem>>, vector<8x16xf32>
      tpu.vector_store %arg6[%c0_11, %c0_12], %12 {strides = array<i32>} : memref<8x16xf32, #tpu.memory_space<vmem>>, vector<8x16xf32>,
    } else {
    }
    %c0 = arith.constant 0 : index
    %c0_1 = arith.constant 0 : index
    %3 = vector.load %arg6[%c0, %c0_1] : memref<8x16xf32, #tpu.memory_space<vmem>>, vector<8x16xf32>
    %c0_2 = arith.constant 0 : index
    %c0_3 = arith.constant 0 : index
    %4 = vector.load %arg2[%c0_2, %c0_3] : memref<8x32xbf16, #tpu.memory_space<vmem>>, vector<8x32xbf16>
    %c0_4 = arith.constant 0 : index
    %c0_5 = arith.constant 0 : index
    %5 = vector.load %arg3[%c0_4, %c0_5] : memref<32x16xbf16, #tpu.memory_space<vmem>>, vector<32x16xbf16>
    %cst = arith.constant dense<0.000000e+00> : vector<8x16xf32>
    %6 = tpu.matmul %4, %5, %cst {dimension_numbers = #tpu.dot_dimension_numbers<[1], [0], [0], [1], [0, 0, 1, 1], [], []>} : vector<8x32xbf16>, vector<32x16xbf16>, vector<8x16xf32> -> vector<8x16xf32>
    %7 = arith.addf %3, %6 : vector<8x16xf32>
    %c0_6 = arith.constant 0 : index
    %c0_7 = arith.constant 0 : index
    %8 = vector.load %arg6[%c0_6, %c0_7] : memref<8x16xf32, #tpu.memory_space<vmem>>, vector<8x16xf32>
    tpu.vector_store %arg6[%c0_6, %c0_7], %7 {strides = array<i32>} : memref<8x16xf32, #tpu.memory_space<vmem>>, vector<8x16xf32>,
    %c0_i32_8 = arith.constant 0 : i32
    %9 = arith.cmpi eq, %arg1, %c0_i32_8 : i32
    %10 = arith.extui %9 : i1 to i32
    %c0_i32_9 = arith.constant 0 : i32
    %11 = arith.cmpi ne, %10, %c0_i32_9 : i32
    scf.if %11 {
      %c0_10 = arith.constant 0 : index
      %c0_11 = arith.constant 0 : index
      %12 = vector.load %arg6[%c0_10, %c0_11] : memref<8x16xf32, #tpu.memory_space<vmem>>, vector<8x16xf32>
      %c0_12 = arith.constant 0 : index
      %c0_13 = arith.constant 0 : index
      %13 = vector.load %arg4[%c0_12, %c0_13] : memref<1x16xf32, #tpu.memory_space<vmem>>, vector<1x16xf32>
      %14 = vector.broadcast %13 : vector<1x16xf32> to vector<8x16xf32>
      %15 = arith.addf %12, %14 : vector<8x16xf32>
      %c0_14 = arith.constant 0 : index
      %c0_15 = arith.constant 0 : index
      %16 = vector.load %arg5[%c0_14, %c0_15] : memref<8x16xf32, #tpu.memory_space<vmem>>, vector<8x16xf32>
      tpu.vector_store %arg5[%c0_14, %c0_15], %15 {strides = array<i32>} : memref<8x16xf32, #tpu.memory_space<vmem>>, vector<8x16xf32>,
    } else {
    }
    return
  }
  func.func @transform_0(%arg0: i32, %arg1: i32) -> (i32, i32) {
    %c0_i32 = arith.constant 0 : i32
    return %arg0, %arg1 : i32, i32
  }
  func.func @transform_1(%arg0: i32, %arg1: i32) -> (i32, i32) {
    %c0_i32 = arith.constant 0 : i32
    %c0_i32_0 = arith.constant 0 : i32
    return %arg1, %c0_i32 : i32, i32
  }
  func.func @transform_2(%arg0: i32, %arg1: i32) -> (i32, i32) {
    %c0_i32 = arith.constant 0 : i32
    %c0_i32_0 = arith.constant 0 : i32
    %c0_i32_1 = arith.constant 0 : i32
    return %c0_i32, %c0_i32_0 : i32, i32
  }
  func.func @transform_3(%arg0: i32, %arg1: i32) -> (i32, i32) {
    %c0_i32 = arith.constant 0 : i32
    %c0_i32_0 = arith.constant 0 : i32
    return %arg0, %c0_i32 : i32, i32
  }
}

</mosaic_0001>

<bundles_post_ra>
// kernel: tpu_custom_call.1
= control target key start
LH: loop header
LB: loop body
LE: loop exit
PB: predicated region body
PF: predicated region fallthrough
CT: control target
= control target key end

     0   :  { %vm20_vm0 = vcmask 130048   ;;  %s166_s0 = inlined_call_operand.vmem [shape: bf16[8,32], index: 0, kind: input, shape index: {}]   ;;  %s167_s1 = inlined_call_operand.vmem [shape: bf16[32,16], index: 1, kind: input, shape index: {}]   ;;  %s168_s2 = inlined_call_operand.vmem [shape: f32[1,16], index: 2, kind: input, shape index: {}]   ;;  %s169_s3 = inlined_call_operand.hbm [shape: f32[8,16], index: 3, kind: output, shape index: {}]  }
   0x1   :  { %v96_v0 = vld [vmem:[%s167_s1 + $0x8] sm:$0xff] }
   0x2   :  { %8 = vsyncpa [#allocation4], 0  ;;  %50 = vmatpush.bf16.msra.mxu0 %v96_v0  ;;  %v95_v1 = vld [vmem:[%s167_s1] sm:$0xff]  ;;  %v126_v2 = vmov 0.0   ;;  %vm40_vm1 = vcmask 261120   ;;  %s127_s1 = smov [#allocation3]  }
   0x3   :  { %21 = vst.msk [vmem:[#allocation2] sm:$0xff] %vm20_vm0, %v126_v2  ;;  %v23_v3 = vld [vmem:[%s166_s0] sm:$0xf]  ;;  %s75_s20 = sshll.u32 %s127_s1, 4  ;;  %s77_s23 = sshll.u32 %s169_s3, 4  ;;  %s76_s20 = int_to_ptr.vmem [resolvable:$true] %s75_s20  ;;  %s78_s23 = int_to_ptr.hbm [resolvable:$true] %s77_s23 }
   0x4   :  { %v99_v7 = vld [vmem:[%s168_s2] ss:$0 sm:$0xff] }
   0x6   :  { %51 = vmatpush.bf16.msra.mxu0 %v95_v1 }
   0x9   :  { %94 = vmatmul.msk.bf16.vlgmr.msra.gmra.mxu0 %vm40_vm1, %v23_v3 }
   0xa   :  { %v22_v4 = vld [vmem:[#allocation2] sm:$0xff] }
  0x86   :  { %v53_v5 = vpop.f32.mrf.mxu0 }
  0x87   :  { %v57_v6 = vadd.f32 %v53_v5, %v22_v4 }
  0x89   :  { %59 = vst.msk [vmem:[#allocation2] sm:$0xff] %vm20_vm0, %v57_v6 }
  0x8e   :  { %v55_v8 = vpop.f32.mrf.mxu0 }
  0x90   :  { %v63_v9 = vld [vmem:[#allocation2] sm:$0xff] }
  0x91   :  { %v68_v10 = vadd.f32 %v99_v7, %v63_v9 }
  0x93   :  { %69 = vst.msk [vmem:[#allocation3] sm:$0xff] %vm20_vm0, %v68_v10 }
  0x94   :  { %80 = dma.vmem_to_hbm [thread:$0]  %s76_s20, 128, %s78_s23, [#allocation4]  }
  0x95   :  { %124 = dma.done.wait [#allocation4], 128  }
  0x96   :  { %125 = vsyncadd [#allocation4], 4294967168 }
  0x97   :  { %85 = vsyncpa [#allocation4], 1 }

</bundles_post_ra>
